<compile_context>
chip_gen: v7x
topology: tpu7x:2x2x1
jax: 0.10.0
libtpu: 0.0.40
codegen_flags: <defaults>
</compile_context>

<pallas_src>
import functools

import jax
import jax.numpy as jnp
from jax import lax
from jax.experimental import pallas as pl
from jax.experimental.pallas import tpu as pltpu


def _comm_kernel(x_ref, w_ref, bias_ref, aff_ref, o_ref):
    # x_ref block: (BB, P, F); constants are already in their kernel dtypes.
    aff = aff_ref[...]                 # (4, F) f32, packed affine params
    a1 = aff[0:1, :]                   # (1, F) -> broadcasts over (P, F)
    b1 = aff[1:2, :]
    a2 = aff[2:3, :]
    b2 = aff[3:4, :]
    bias = bias_ref[...]               # (P, 1) f32, fc1 bias (patch axis)
    w = w_ref[...]                     # (P, P) in the MXU dot dtype (pre-cast on host)

    bb = x_ref.shape[0]

    def process(b):
        # Only one (P, F)-sized f32 slice of temporaries is live at a time.
        xf = x_ref[b].astype(jnp.float32)                       # (P, F)
        h = a1 * xf + b1                                        # aff1 (f32 VPU math)
        # fc1 mixes the patch dim: y = W @ h  (stationary W, f32 accumulate).
        y = jnp.dot(w, h.astype(w.dtype),
                    preferred_element_type=jnp.float32) + bias  # (P, F) f32
        # aff2 + residual (residual is the post-aff1 h), fused into the store.
        o_ref[b] = (a2 * y + b2 + h).astype(o_ref.dtype)

    if bb <= 8:
        # Short static trip count: unroll so the LLO scheduler sees everything.
        for b in range(bb):
            process(b)
    else:
        def body(b, carry):
            process(b)
            return carry
        lax.fori_loop(0, bb, body, 0)


def _vmem_capacity_bytes():
    try:
        return int(pltpu.get_tpu_info().vmem_capacity_bytes)
    except Exception:
        return 128 * 1024 * 1024  # conservative default (v5e/v6e class)


def _choose_block_batch(B, P, F, itemsize, vmem_capacity_bytes):
    """Pick how many batch elements to process per grid step."""
    per_batch_io = P * F * itemsize  # one batch slice of x (== one of out)

    if vmem_capacity_bytes >= 96 * 1024 * 1024:
        # v5e / v6e: 128 MiB physical VMEM -> go big.
        block_budget = 64 * 1024 * 1024
        target_block_bytes = 8 * 1024 * 1024
    else:
        # v7x: 64 MiB physical VMEM -> keep the double-buffered footprint small.
        block_budget = 24 * 1024 * 1024
        target_block_bytes = 4 * 1024 * 1024

    # Double-buffered input + output blocks (2 bufs each = 4x) plus ~1x block of
    # headroom for the f32 temporaries / constants.
    bytes_per_bb = 5 * per_batch_io
    vmem_cap = max(1, block_budget // bytes_per_bb)
    # Move at least ~target_block_bytes of HBM traffic per step.
    want = max(1, -(-target_block_bytes // per_batch_io))
    bb = min(B, vmem_cap, want)

    # Keep >= 4 grid steps when possible so v7x's two TensorCores each get
    # >= 2 steps and double-buffering can hide the input DMA.
    if B >= 4:
        bb = min(bb, B // 4)
    elif B >= 2:
        bb = min(bb, B // 2)
    bb = max(1, bb)

    # Snap down to a divisor of B so the grid tiles exactly.
    while B % bb != 0:
        bb -= 1
    return bb


def communication_layer(x, w, bias, alpha1, beta1, alpha2, beta2,
                        *, block_batch=None, dot_dtype=None,
                        vmem_limit_bytes=None):
    """x: (B, P, F); w: (P, P); bias: (P,); alpha*/beta*: (F,)."""
    B, P, F = x.shape
    vmem_capacity = _vmem_capacity_bytes()

    if block_batch is None:
        block_batch = _choose_block_batch(
            B, P, F, jnp.dtype(x.dtype).itemsize, vmem_capacity)
    assert B % block_batch == 0

    if dot_dtype is None:
        # Keep the matmul in the model dtype (bf16 model -> bf16 MXU operands,
        # f32 accumulate; f32 model -> f32 for faithful numerics).
        dot_dtype = x.dtype

    if vmem_limit_bytes is None:
        vmem_limit_bytes = (100 * 1024 * 1024 if vmem_capacity >= 96 * 1024 * 1024
                            else 48 * 1024 * 1024)

    # Pre-cast constants on the host: no per-grid-step casts in the kernel, and
    # the weight DMA bytes shrink in bf16 mode.
    w_cast = w.astype(dot_dtype)                                  # (P, P)
    bias2d = bias.reshape(P, 1).astype(jnp.float32)               # (P, 1)
    # Pack the four per-feature affine vectors into one operand: fewer DMA
    # descriptors and less resident VMEM for constants.
    aff = jnp.stack([alpha1, beta1, alpha2, beta2],
                    axis=0).astype(jnp.float32)                   # (4, F)

    const2d = lambda b: (0, 0)

    return pl.pallas_call(
        _comm_kernel,
        out_shape=jax.ShapeDtypeStruct((B, P, F), x.dtype),
        grid_spec=pltpu.PrefetchScalarGridSpec(
            num_scalar_prefetch=0,
            grid=(B // block_batch,),
            in_specs=[
                pl.BlockSpec((block_batch, P, F), lambda b: (b, 0, 0)),  # x block
                pl.BlockSpec((P, P), const2d),                           # fc1 weight
                pl.BlockSpec((P, 1), const2d),                           # fc1 bias
                pl.BlockSpec((4, F), const2d),                           # packed affines
            ],
            out_specs=pl.BlockSpec((block_batch, P, F), lambda b: (b, 0, 0)),
        ),
        compiler_params=pltpu.CompilerParams(
            dimension_semantics=("parallel",),
            vmem_limit_bytes=vmem_limit_bytes,
        ),
    )(x, w_cast, bias2d, aff)


def _reference(x, w, bias, alpha1, beta1, alpha2, beta2):
    h = alpha1[None, None, :] * x + beta1[None, None, :]
    # Linear over the patch dim: (B, F, P) @ W^T + b, transposed back to (B, P, F)
    y = jnp.einsum("bqf,pq->bpf", h, w) + bias[None, :, None]
    return alpha2[None, None, :] * y + beta2[None, None, :] + h


if __name__ == "__main__":
    # Small but lane-dense shapes: F is a multiple of 128 so the output block
    # gets unmasked vector stores; B=8 -> block_batch=2, grid of 4 steps.
    B, P, F = 8, 16, 256

    key = jax.random.PRNGKey(0)
    kx, kw, kb, ka1, kb1, ka2, kb2 = jax.random.split(key, 7)

    x = jax.random.normal(kx, (B, P, F), dtype=jnp.float32)

    # nn.Linear(num_patches, num_patches): weight (P, P), bias (P,)
    limit = 1.0 / (P ** 0.5)
    w = jax.random.uniform(kw, (P, P), minval=-limit, maxval=limit, dtype=jnp.float32)
    bias = jax.random.uniform(kb, (P,), minval=-limit, maxval=limit, dtype=jnp.float32)

    # AffineTransform params (module inits ones/zeros; randomized for a stronger test)
    alpha1 = 1.0 + 0.1 * jax.random.normal(ka1, (F,), dtype=jnp.float32)
    beta1 = 0.1 * jax.random.normal(kb1, (F,), dtype=jnp.float32)
    alpha2 = 1.0 + 0.1 * jax.random.normal(ka2, (F,), dtype=jnp.float32)
    beta2 = 0.1 * jax.random.normal(kb2, (F,), dtype=jnp.float32)

    out = communication_layer(x, w, bias, alpha1, beta1, alpha2, beta2)
    out = jax.block_until_ready(out)

    ref = _reference(x, w, bias, alpha1, beta1, alpha2, beta2)
    assert out.shape == (B, P, F)
    assert jnp.allclose(out, ref, atol=1e-4, rtol=1e-4), "mismatch vs reference"

    print("KERNEL_OK")
</pallas_src>

<mosaic_0001>
module attributes {stable_mosaic.version = 11 : i64} {
  func.func @_comm_kernel(%arg0: i32, %arg1: memref<2x16x256xf32, #tpu.memory_space<vmem>>, %arg2: memref<16x16xf32, #tpu.memory_space<vmem>>, %arg3: memref<16x1xf32, #tpu.memory_space<vmem>>, %arg4: memref<4x256xf32, #tpu.memory_space<vmem>>, %arg5: memref<2x16x256xf32, #tpu.memory_space<vmem>>) attributes {dimension_semantics = [#tpu.dimension_semantics<parallel>], iteration_bounds = array<i64: 4>, scalar_prefetch = 0 : i64, scratch_operands = 0 : i64, tpu.core_type = #tpu.core_type<tc>, window_params = [{transform_indices = @transform_0, window_bounds = array<i64: 2, 16, 256>}, {pipeline_mode = #tpu.pipeline_mode<synchronous>, transform_indices = @transform_1, window_bounds = array<i64: 16, 16>}, {pipeline_mode = #tpu.pipeline_mode<synchronous>, transform_indices = @transform_2, window_bounds = array<i64: 16, 1>}, {pipeline_mode = #tpu.pipeline_mode<synchronous>, transform_indices = @transform_3, window_bounds = array<i64: 4, 256>}, {transform_indices = @transform_4, window_bounds = array<i64: 2, 16, 256>}]} {
    %c0 = arith.constant 0 : index
    %c0_0 = arith.constant 0 : index
    %0 = vector.load %arg4[%c0, %c0_0] : memref<4x256xf32, #tpu.memory_space<vmem>>, vector<4x256xf32>
    %1 = vector.extract_strided_slice %0 {offsets = [0, 0], sizes = [1, 256], strides = [1, 1]} : vector<4x256xf32> to vector<1x256xf32>
    %2 = vector.extract_strided_slice %0 {offsets = [1, 0], sizes = [1, 256], strides = [1, 1]} : vector<4x256xf32> to vector<1x256xf32>
    %3 = vector.extract_strided_slice %0 {offsets = [2, 0], sizes = [1, 256], strides = [1, 1]} : vector<4x256xf32> to vector<1x256xf32>
    %4 = vector.extract_strided_slice %0 {offsets = [3, 0], sizes = [1, 256], strides = [1, 1]} : vector<4x256xf32> to vector<1x256xf32>
    %c0_1 = arith.constant 0 : index
    %c0_2 = arith.constant 0 : index
    %5 = vector.load %arg3[%c0_1, %c0_2] : memref<16x1xf32, #tpu.memory_space<vmem>>, vector<16x1xf32>
    %c0_3 = arith.constant 0 : index
    %c0_4 = arith.constant 0 : index
    %6 = vector.load %arg2[%c0_3, %c0_4] : memref<16x16xf32, #tpu.memory_space<vmem>>, vector<16x16xf32>
    %c0_5 = arith.constant 0 : index
    %c0_6 = arith.constant 0 : index
    %c0_7 = arith.constant 0 : index
    %7 = vector.load %arg1[%c0_5, %c0_6, %c0_7] : memref<2x16x256xf32, #tpu.memory_space<vmem>>, vector<1x16x256xf32>
    %8 = vector.shape_cast %7 : vector<1x16x256xf32> to vector<16x256xf32>
    %9 = vector.broadcast %1 : vector<1x256xf32> to vector<16x256xf32>
    %10 = arith.mulf %9, %8 : vector<16x256xf32>
    %11 = vector.broadcast %2 : vector<1x256xf32> to vector<16x256xf32>
    %12 = arith.addf %10, %11 : vector<16x256xf32>
    %cst = arith.constant dense<0.000000e+00> : vector<16x256xf32>
    %13 = tpu.matmul %6, %12, %cst {dimension_numbers = #tpu.dot_dimension_numbers<[1], [0], [0], [1], [0, 0, 1, 1], [], []>} : vector<16x16xf32>, vector<16x256xf32>, vector<16x256xf32> -> vector<16x256xf32>
    %14 = vector.broadcast %5 : vector<16x1xf32> to vector<16x256xf32>
    %15 = arith.addf %13, %14 : vector<16x256xf32>
    %16 = vector.broadcast %3 : vector<1x256xf32> to vector<16x256xf32>
    %17 = arith.mulf %16, %15 : vector<16x256xf32>
    %18 = vector.broadcast %4 : vector<1x256xf32> to vector<16x256xf32>
    %19 = arith.addf %17, %18 : vector<16x256xf32>
    %20 = arith.addf %19, %12 : vector<16x256xf32>
    %c0_8 = arith.constant 0 : index
    %c0_9 = arith.constant 0 : index
    %c0_10 = arith.constant 0 : index
    %21 = vector.load %arg5[%c0_8, %c0_9, %c0_10] : memref<2x16x256xf32, #tpu.memory_space<vmem>>, vector<1x16x256xf32>
    %22 = vector.shape_cast %21 : vector<1x16x256xf32> to vector<16x256xf32>
    %23 = vector.shape_cast %20 : vector<16x256xf32> to vector<1x16x256xf32>
    tpu.vector_store %arg5[%c0_8, %c0_9, %c0_10], %23 {strides = array<i32>} : memref<2x16x256xf32, #tpu.memory_space<vmem>>, vector<1x16x256xf32>,
    %c1 = arith.constant 1 : index
    %c0_11 = arith.constant 0 : index
    %c0_12 = arith.constant 0 : index
    %24 = vector.load %arg1[%c1, %c0_11, %c0_12] : memref<2x16x256xf32, #tpu.memory_space<vmem>>, vector<1x16x256xf32>
    %25 = vector.shape_cast %24 : vector<1x16x256xf32> to vector<16x256xf32>
    %26 = vector.broadcast %1 : vector<1x256xf32> to vector<16x256xf32>
    %27 = arith.mulf %26, %25 : vector<16x256xf32>
    %28 = vector.broadcast %2 : vector<1x256xf32> to vector<16x256xf32>
    %29 = arith.addf %27, %28 : vector<16x256xf32>
    %cst_13 = arith.constant dense<0.000000e+00> : vector<16x256xf32>
    %30 = tpu.matmul %6, %29, %cst_13 {dimension_numbers = #tpu.dot_dimension_numbers<[1], [0], [0], [1], [0, 0, 1, 1], [], []>} : vector<16x16xf32>, vector<16x256xf32>, vector<16x256xf32> -> vector<16x256xf32>
    %31 = vector.broadcast %5 : vector<16x1xf32> to vector<16x256xf32>
    %32 = arith.addf %30, %31 : vector<16x256xf32>
    %33 = vector.broadcast %3 : vector<1x256xf32> to vector<16x256xf32>
    %34 = arith.mulf %33, %32 : vector<16x256xf32>
    %35 = vector.broadcast %4 : vector<1x256xf32> to vector<16x256xf32>
    %36 = arith.addf %34, %35 : vector<16x256xf32>
    %37 = arith.addf %36, %29 : vector<16x256xf32>
    %c1_14 = arith.constant 1 : index
    %c0_15 = arith.constant 0 : index
    %c0_16 = arith.constant 0 : index
    %38 = vector.load %arg5[%c1_14, %c0_15, %c0_16] : memref<2x16x256xf32, #tpu.memory_space<vmem>>, vector<1x16x256xf32>
    %39 = vector.shape_cast %38 : vector<1x16x256xf32> to vector<16x256xf32>
    %40 = vector.shape_cast %37 : vector<16x256xf32> to vector<1x16x256xf32>
    tpu.vector_store %arg5[%c1_14, %c0_15, %c0_16], %40 {strides = array<i32>} : memref<2x16x256xf32, #tpu.memory_space<vmem>>, vector<1x16x256xf32>,
    return
  }
  func.func @transform_0(%arg0: i32) -> (i32, i32, i32) {
    %c0_i32 = arith.constant 0 : i32
    %c0_i32_0 = arith.constant 0 : i32
    %c0_i32_1 = arith.constant 0 : i32
    return %arg0, %c0_i32, %c0_i32_0 : i32, i32, i32
  }
  func.func @transform_1(%arg0: i32) -> (i32, i32) {
    %c0_i32 = arith.constant 0 : i32
    %c0_i32_0 = arith.constant 0 : i32
    %c0_i32_1 = arith.constant 0 : i32
    return %c0_i32, %c0_i32_0 : i32, i32
  }
  func.func @transform_2(%arg0: i32) -> (i32, i32) {
    %c0_i32 = arith.constant 0 : i32
    %c0_i32_0 = arith.constant 0 : i32
    %c0_i32_1 = arith.constant 0 : i32
    return %c0_i32, %c0_i32_0 : i32, i32
  }
  func.func @transform_3(%arg0: i32) -> (i32, i32) {
    %c0_i32 = arith.constant 0 : i32
    %c0_i32_0 = arith.constant 0 : i32
    %c0_i32_1 = arith.constant 0 : i32
    return %c0_i32, %c0_i32_0 : i32, i32
  }
  func.func @transform_4(%arg0: i32) -> (i32, i32, i32) {
    %c0_i32 = arith.constant 0 : i32
    %c0_i32_0 = arith.constant 0 : i32
    %c0_i32_1 = arith.constant 0 : i32
    return %arg0, %c0_i32, %c0_i32_0 : i32, i32, i32
  }
}

</mosaic_0001>

<bundles_post_ra>
// kernel: tpu_custom_call.1
= control target key start
LH: loop header
LB: loop body
LE: loop exit
PB: predicated region body
PF: predicated region fallthrough
CT: control target
= control target key end

     0   :  { %9 = vsyncpa [#allocation3], 0  ;;  %s1360_s0 = inlined_call_operand.hbm [shape: f32[8,16,256], index: 0, kind: input, shape index: {}]   ;;  %s1361_s1 = inlined_call_operand.hbm [shape: f32[16,16], index: 1, kind: input, shape index: {}]   ;;  %s1362_s2 = inlined_call_operand.hbm [shape: f32[16,1], index: 2, kind: input, shape index: {}]   ;;  %s1363_s3 = inlined_call_operand.hbm [shape: f32[4,256], index: 3, kind: input, shape index: {}]   ;;  %s1364_s4 = inlined_call_operand.hbm [shape: f32[8,16,256], index: 4, kind: output, shape index: {}]  }
   0x1   :  { %11 = vsyncpa [#allocation3 + $0x1], 0 }
   0x2   :  { %12 = vsyncpa [#allocation6], 0 }
   0x3   :  { %13 = vsyncpa [#allocation9], 0 }
   0x4   :  { %14 = vsyncpa [#allocation4], 0 }
   0x5   :  { %16 = vsyncpa [#allocation4 + $0x1], 0  ;;  %s1045_s15 = smov 0   ;;  %s1047_s16 = smov 0  }
   0x6   :  { %s1049_s17 = smov 0   ;;  %s1051_s18 = smov 0  }
   0x7 LB: > { %s1066_s19 = sadd.s32 4294967295, %s1005_s18   ;;  %s685_s20 = sadd.s32 4294967294, %s1005_s18   ;;  %s1005_s18 = sphi %s1051_s18, %s1386_s18   ;;  %s1001_s17 = sphi %s1049_s17, %s1385_s17   ;;  %s997_s16 = sphi %s1047_s16, %s1384_s16   ;;  %s993_s15 = sphi %s1045_s15, %s1383_s15  }
   0x8   : > { %p42_p0 = scmp.ne.s32.totalorder %s997_s16, %s993_s15  ;;  %p1365_p1 = scmp.eq.s32.totalorder %s1066_s19, 0 }
   0x9   : > { %p135_p3 = scmp.eq.s32.totalorder %s685_s20, 3  ;;  %p686_p5 = scmp.ge.s32.totalorder %s1005_s18, 1 }
   0xa   : > { %p1075_p4 = por %p1365_p1, %p42_p0  ;;  %p142_p7 = scmp.lt.s32.totalorder %s1005_s18, 5 }
   0xb   : > { %p1080_p6 = por %p135_p3, %p42_p0  ;;  %s1007_s24 = smov [#allocation5]  }
   0xc   : > { %s1368_s21 = scalar_select %p1075_p4, 1, 0 }
   0xd   : > { %s1369_s22 = scalar_select %p1080_p6, 1, 0 }
   0xe   : > { %p1085_p8 = pnand %p686_p5, %p142_p7  ;;  %s154_s25 = sshll.u32 %s1007_s24, 4  ;;  %s1089_s25 = int_to_ptr.vmem [resolvable:$true] %s154_s25 }
   0xf   : > { %s1008_s27 = smov [#allocation7]   ;;  %s1009_s29 = smov [#allocation8]  }
  0x10   : > { %s1370_s23 = scalar_select %p1085_p8, 1, 0 }
  0x11   : > { %p747_p9 = pneg %p1085_p8  ;;  %s167_s28 = sshll.u32 %s1008_s27, 4  ;;  %s1099_s28 = int_to_ptr.vmem [resolvable:$true] %s167_s28 }
  0x12   : > { %s1101_s30 = sshll.u32 %s1009_s29, 4  ;;  %s817_s7 = scalar_lea.hbm %s1361_s1, 256  ;;  %s182_s30 = int_to_ptr.vmem [resolvable:$true] %s1101_s30 }
  0x13   : > { %p1095_p10 = pnand %p747_p9, %p1365_p1  ;;  %p818_p11 = scmp.ne.s32.totalorder %s1361_s1, %s817_s7 }
  0x14   : > { %p824_p3 = scmp.lt.u32.totalorder %s817_s7, %s1361_s1 }
  0x15   : > { %p1111_p12 = pneg %p1095_p10 }
  0x17   : > { %p820_p13 = pnand %p1111_p12, %p818_p11 }
  0x19   : > { %p821_p0 = pneg %p820_p13 }
  0x1b   : > { %p826_p5 = pnand %p824_p3, %p821_p0 }
  0x1d   : > { %829 = shalt.err (!%p826_p5)
}
  0x1e   : > { %s830_s13 = scalar_lea.vmem %s1089_s25, 256  ;;  %p838_p2 = scmp.lt.s32.totalorder %s1089_s25, %s1089_s25 }
  0x1f   : > { %p831_p7 = scmp.ne.s32.totalorder %s1089_s25, %s830_s13  ;;  %p839_p6 = scmp.lt.s32.totalorder %s830_s13, %s830_s13 }
  0x21   : > { %p833_p9 = pnand %p831_p7, %p1111_p12  ;;  %p840_p11 = por %p839_p6, %p838_p2 }
  0x23   : > { %p834_p1 = pneg %p833_p9 }
  0x25   : > { %p841_p13 = pnand %p840_p11, %p834_p1 }
  0x27   : > { %844 = shalt.err (!%p841_p13)
}
  0x28   : > { %s1010_s14 = smov 128   ;;  %s1011_s20 = smov 8  }
  0x29   : > { %750 = dma.hbm_to_vmem [thread:$0]  (!%p1095_p10), %s1361_s1, 256, %s1089_s25, [#allocation6], %s1010_s14, %s1010_s14, %s1011_s20  }
  0x2a   : > { %s845_s6 = scalar_lea.hbm %s1362_s2, 256 }
  0x2b   : > { %p846_p2 = scmp.ne.s32.totalorder %s1362_s2, %s845_s6  ;;  %p852_p0 = scmp.lt.u32.totalorder %s845_s6, %s1362_s2 }
  0x2d   : > { %p848_p1 = pnand %p846_p2, %p1111_p12 }
  0x2f   : > { %p849_p6 = pneg %p848_p1 }
  0x31   : > { %p854_p3 = pnand %p852_p0, %p849_p6 }
  0x33   : > { %857 = shalt.err (!%p854_p3)
}
  0x34   : > { %s858_s25 = scalar_lea.vmem %s1099_s28, 256  ;;  %p866_p11 = scmp.lt.s32.totalorder %s1099_s28, %s1099_s28 }
  0x35   : > { %p859_p5 = scmp.ne.s32.totalorder %s1099_s28, %s858_s25  ;;  %p867_p13 = scmp.lt.s32.totalorder %s858_s25, %s858_s25 }
  0x37   : > { %p861_p7 = pnand %p859_p5, %p1111_p12  ;;  %p868_p2 = por %p867_p13, %p866_p11 }
  0x39   : > { %p862_p9 = pneg %p861_p7 }
  0x3b   : > { %p869_p1 = pnand %p868_p2, %p862_p9 }
  0x3d   : > { %872 = shalt.err (!%p869_p1)
}
  0x3e   : > { %753 = dma.hbm_to_vmem [thread:$0]  (!%p1095_p10), %s1362_s2, 256, %s1099_s28, [#allocation6], %s1010_s14, %s1010_s14, %s1011_s20  }
  0x3f   : > { %s873_s29 = scalar_lea.hbm %s1363_s3, 128 }
  0x40   : > { %p874_p6 = scmp.ne.s32.totalorder %s1363_s3, %s873_s29  ;;  %p880_p5 = scmp.lt.u32.totalorder %s873_s29, %s1363_s3 }
  0x42   : > { %p876_p0 = pnand %p874_p6, %p1111_p12 }
  0x44   : > { %p877_p3 = pneg %p876_p0 }
  0x46   : > { %p882_p7 = pnand %p880_p5, %p877_p3 }
  0x48   : > { %885 = shalt.err (!%p882_p7)
}
  0x49   : > { %s886_s9 = scalar_lea.vmem %s182_s30, 128  ;;  %p894_p2 = scmp.lt.s32.totalorder %s182_s30, %s182_s30 }
  0x4a   : > { %p887_p9 = scmp.ne.s32.totalorder %s182_s30, %s886_s9  ;;  %p895_p1 = scmp.lt.s32.totalorder %s886_s9, %s886_s9 }
  0x4c   : > { %p889_p11 = pnand %p887_p9, %p1111_p12  ;;  %p896_p4 = por %p895_p1, %p894_p2 }
  0x4e   : > { %p890_p13 = pneg %p889_p11 }
  0x50   : > { %p897_p8 = pnand %p896_p4, %p890_p13 }
  0x52   : > { %900 = shalt.err (!%p897_p8)
}
  0x53   : > { %756 = dma.hbm_to_vmem [thread:$0]  (!%p1095_p10), %s1363_s3, 128, %s182_s30, [#allocation9]  }
  0x54   : > { %s1175_s10 = sadd.s32 1, %s1005_s18   ;;  %s29_s26 = sadd.s32 1, %s1001_s17 }
  0x55   : > { %s26_s20 = ssub.s32 %s1005_s18, %s1175_s10  ;;  %p36_p8 = scmp.ne.s32.totalorder %s1001_s17, %s997_s16 }
  0x56   : > { %p27_p4 = scmp.eq.s32.totalorder %s26_s20, 0  ;;  %p37_p12 = scmp.eq.s32.totalorder %s1005_s18, 0 }
  0x57   : > { %p768_p6 = scmp.lt.s32.totalorder %s1005_s18, 4  ;;  %p1373_p3 = scmp.eq.s32.totalorder %s1066_s19, 3 }
  0x58   : > { %s1185_s11 = scalar_select %p27_p4, %s1001_s17, %s29_s26  }
  0x59   : > { %p38_p0 = por %p37_p12, %p36_p8  ;;  %p1189_p5 = por %p1373_p3, %p36_p8 }
  0x5a   : > { %s192_s12 = sand.u32 1, %s1001_s17   ;;  %s720_s13 = sshll.u32 %s1005_s18, 10 }
  0x5b   : > { %s691_s30 = sshll.u32 %s192_s12, 6  ;;  %s1198_s29 = scalar_lea.hbm %s1360_s0, %s720_s13 }
  0x5c   : > { %s196_s5 = scalar_lea.vmem [#allocation2], %s691_s30  ;;  %p1200_p10 = pnand %p768_p6, %p38_p0 }
  0x5d   : > { %s204_s6 = sshll.u32 %s196_s5, 4  ;;  %s1206_s8 = scalar_lea.sflag [#allocation3], %s192_s12  ;;  %s1204_s6 = int_to_ptr.vmem [resolvable:$true] %s204_s6 }
  0x5e   : > { %s901_s9 = scalar_lea.hbm %s1198_s29, 1024  ;;  %p903_p9 = pneg %p1200_p10 }
  0x5f   : > { %p902_p7 = scmp.ne.s32.totalorder %s1198_s29, %s901_s9  ;;  %s906_s20 = scalar_lea.hbm %s1360_s0, 4096 }
  0x60   : > { %p907_p2 = scmp.lt.u32.totalorder %s1198_s29, %s1360_s0  ;;  %p908_p1 = scmp.lt.u32.totalorder %s906_s20, %s901_s9 }
  0x61   : > { %p904_p11 = pnand %p903_p9, %p902_p7  ;;  %p910_p8 = scmp.lt.u32.totalorder %s901_s9, %s1198_s29 }
  0x62   : > { %p909_p4 = por %p908_p1, %p907_p2 }
  0x63   : > { %p905_p13 = pneg %p904_p11 }
  0x64   : > { %p911_p12 = por %p910_p8, %p909_p4 }
  0x66   : > { %p912_p6 = pnand %p911_p12, %p905_p13 }
  0x68   : > { %915 = shalt.err (!%p912_p6)
}
  0x69   : > { %s916_s12 = scalar_lea.vmem %s1204_s6, 1024  ;;  %s1012_s30 = smov [#allocation2]  }
  0x6a   : > { %p917_p0 = scmp.ne.s32.totalorder %s1204_s6, %s916_s12  ;;  %s921_s24 = sshll.u32 %s1012_s30, 4  ;;  %s922_s24 = int_to_ptr.vmem [resolvable:$false] %s921_s24 }
  0x6b   : > { %s923_s27 = scalar_lea.vmem %s922_s24, 2048  ;;  %p924_p11 = scmp.lt.s32.totalorder %s1204_s6, %s922_s24 }
  0x6c   : > { %p919_p3 = pnand %p917_p0, %p903_p9  ;;  %p925_p2 = scmp.lt.s32.totalorder %s923_s27, %s916_s12 }
  0x6e   : > { %p920_p7 = pneg %p919_p3  ;;  %p926_p1 = por %p925_p2, %p924_p11 }
  0x70   : > { %p927_p4 = pnand %p926_p1, %p920_p7 }
  0x72   : > { %930 = shalt.err (!%p927_p4)
}
  0x73   : > { %s1013_s5 = smov 256   ;;  %s1014_s9 = smov 16  }
  0x74   : > { %760 = dma.hbm_to_vmem [thread:$0]  (!%p1200_p10), %s1198_s29, 1024, %s1204_s6, %s1206_s8, %s1013_s5, %s1013_s5, %s1014_s9  }
  0x75   : > { %p1376_p9 = scmp.ne.s32.totalorder %s1370_s23, 0 }
  0x76   : > { %s1237_s28 = sand.u32 (!%p1376_p9), 1, %s997_s16   ;;  %p1377_p13 = scmp.ne.s32.totalorder (!%p1376_p9), %s1368_s21, 0 }
  0x77   : > { %216 = sbr.rel (%p1376_p9) target bundleno = 394 (0x18a), region = 36  ;;  %s696_s14 = sshll.u32 (!%p1376_p9), %s1237_s28, 6 }
  0x78   : > { %s219_s20 = scalar_lea.sflag (!%p1376_p9), [#allocation3], %s1237_s28  ;;  %s1243_s26 = scalar_lea.vmem (!%p1376_p9), [#allocation2], %s696_s14 }
  0x7e   : > { %976 = dma.done.wait (%p1377_p13), %s219_s20, 1024  }
  0x7f   : > { %978 = vsyncadd (%p1377_p13), %s219_s20, 4294966272  ;;  %p1378_p10 = scmp.eq.s32.totalorder %s1066_s19, 0 }
  0x81   : > { %980 = dma.done.wait (%p1378_p10), [#allocation6], 512   ;;  %p1379_p8 = pmov %p1378_p10 }
  0x83   : > { %982 = vsyncadd (%p1379_p8), [#allocation6], 4294966784  ;;  %p1380_p12 = pmov %p1379_p8 }
  0x84   : > { %p1381_p6 = pmov %p1379_p8 }
  0x85   : > { %984 = dma.done.wait (%p1380_p12), [#allocation9], 128  }
  0x86   : > { %986 = vsyncadd (%p1381_p6), [#allocation9], 4294967168  ;;  %v271_v0 = vlaneseq  ;;  %v1015_v1 = vmov 0.0   ;;  %v1016_v3 = vmov 0   ;;  %v1263_v8 = vld [vmem:[#allocation8] sm:$0xff]  ;;  %v267_v9 = vld [vmem:[%s1243_s26 + $0x8] sm:$0xff] }
  0x87   : > { %396 = vmatprep.mubr.f32.mxu0 %v1015_v1  ;;  %538 = vmatprep.mubr.f32.mxu1 %v1015_v1  ;;  %v269_v10 = vld [vmem:[%s1243_s26 + $0x18] sm:$0xff]  ;;  %v704_v13 = vld [vmem:[%s1243_s26 + $0x28] sm:$0xff]  ;;  %v266_v17 = vld [vmem:[%s1243_s26] sm:$0xff]  ;;  %vm325_vm0 = vcmask 130048   ;;  %s722_s21 = sshll.u32 %s1066_s19, 10  ;;  %s258_s23 = scalar_lea.vmem [#allocation10], %s696_s14 }
  0x88   : > { %v1257_v2 = vshrl.u32 %v271_v0, 7  ;;  %816 = vset.pattern.permute.xlu0 %v1016_v3  ;;  %v706_v16 = vld [vmem:[%s1243_s26 + $0x38] sm:$0xff]  ;;  %v268_v18 = vld [vmem:[%s1243_s26 + $0x10] sm:$0xff]  ;;  %v703_v22 = vld [vmem:[%s1243_s26 + $0x20] sm:$0xff]  ;;  %s583_s29 = sshll.u32 %s258_s23, 4  ;;  %s1313_s19 = scalar_lea.hbm %s1364_s4, %s722_s21  ;;  %s1315_s29 = int_to_ptr.vmem [resolvable:$true] %s583_s29 }
  0x89   : > { %v705_v23 = vld [vmem:[%s1243_s26 + $0x30] sm:$0xff]  ;;  %v263_v30 = vld [vmem:[#allocation7 + $0x8] sm:$0xff]  ;;  %v264_v47 = vld [vmem:[#allocation5] sm:$0xff]  ;;  %s569_s8 = scalar_lea.sflag [#allocation4], %s1237_s28  ;;  %s931_s13 = scalar_lea.vmem %s1315_s29, 1024 }
  0x8a   : > { %v273_v4 = vsub.s32 0, %v1257_v2  ;;  %v277_v5 = vsub.s32 4, %v1257_v2  ;;  %v295_v6 = vsub.s32 1, %v1257_v2  ;;  %v299_v7 = vsub.s32 5, %v1257_v2  ;;  %v262_v24 = vld [vmem:[#allocation7] sm:$0xff]  ;;  %v265_v48 = vld [vmem:[#allocation5 + $0x8] sm:$0xff]  ;;  %p932_p0 = scmp.ne.s32.totalorder %s1315_s29, %s931_s13 }
  0x8b   : > { %317 = vperm.xlu0 %816, %v262_v24   ;;  %v411_v49 = vsub.s32 2, %v1257_v2  ;;  %v415_v50 = vsub.s32 6, %v1257_v2  ;;  %v433_v51 = vsub.s32 3, %v1257_v2  ;;  %v437_v52 = vsub.s32 7, %v1257_v2  ;;  %s1017_s12 = smov [#allocation10]  }
  0x8c   : > { %v278_v11 = vrot.slane %v1263_v8, %v277_v5  ;;  %v300_v12 = vrot.slane %v1263_v8, %v299_v7  ;;  %v274_v14 = vrot.slane %v1263_v8, %v273_v4  ;;  %v296_v15 = vrot.slane %v1263_v8, %v295_v6  ;;  %p933_p3 = pnand %p932_p0, %p1189_p5  ;;  %s935_s30 = sshll.u32 %s1017_s12, 4  ;;  %s936_s30 = int_to_ptr.vmem [resolvable:$false] %s935_s30 }
  0x8d   : > { %v412_v53 = vrot.slane %v1263_v8, %v411_v49  ;;  %v416_v54 = vrot.slane %v1263_v8, %v415_v50  ;;  %v434_v56 = vrot.slane %v1263_v8, %v433_v51  ;;  %v438_v57 = vrot.slane %v1263_v8, %v437_v52  ;;  %s937_s24 = scalar_lea.vmem %s936_s30, 2048  ;;  %p938_p11 = scmp.lt.s32.totalorder %s1315_s29, %s936_s30 }
  0x8e   : > { %v288_v19 = vrot.slane %v278_v11, %v273_v4  ;;  %v310_v20 = vrot.slane %v300_v12, %v295_v6  ;;  %v284_v21 = vrot.slane %v274_v14, %v273_v4  ;;  %v306_v25 = vrot.slane %v296_v15, %v295_v6  ;;  %p934_p7 = pneg %p933_p3  ;;  %p939_p2 = scmp.lt.s32.totalorder %s937_s24, %s931_s13 }
  0x8f   : > { %322 = vperm.xlu0 %816, %v263_v30   ;;  %v422_v58 = vrot.slane %v412_v53, %v411_v49  ;;  %v426_v61 = vrot.slane %v416_v54, %v411_v49  ;;  %v444_v63 = vrot.slane %v434_v56, %v433_v51  ;;  %v448_v2 = vrot.slane %v438_v57, %v433_v51 }
  0x90   : > { %v290_v26 = vmul.f32 %v288_v19, %v267_v9  ;;  %v292_v27 = vmul.f32 %v288_v19, %v269_v10  ;;  %v467_v28 = vmul.f32 %v704_v13, %v288_v19  ;;  %v469_v29 = vmul.f32 %v706_v16, %v288_v19  ;;  %p940_p1 = por %p939_p2, %p938_p11 }
  0x91   : > { %v289_v31 = vmul.f32 %v284_v21, %v266_v17  ;;  %v291_v32 = vmul.f32 %v284_v21, %v268_v18  ;;  %v466_v33 = vmul.f32 %v703_v22, %v284_v21  ;;  %v468_v34 = vmul.f32 %v705_v23, %v284_v21 }
  0x92   : > { %v1277_v35 = vadd.f32 %v310_v20, %v290_v26  ;;  %v1279_v36 = vadd.f32 %v310_v20, %v292_v27  ;;  %v1281_v37 = vadd.f32 %v467_v28, %v310_v20  ;;  %v1283_v38 = vadd.f32 %v469_v29, %v310_v20  ;;  %p941_p4 = pnand %p940_p1, %p934_p7 }
  0x93   : > { %v311_v39 = vadd.f32 %v306_v25, %v289_v31  ;;  %v1285_v40 = vadd.f32 %v306_v25, %v291_v32  ;;  %v470_v41 = vadd.f32 %v466_v33, %v306_v25  ;;  %v1287_v42 = vadd.f32 %v468_v34, %v306_v25 }
  0x94   : > { %v723_v43 = vpack.c.bf16 %v1279_v36, %v1277_v35  ;;  %v727_v44 = vpack.c.bf16 %v1283_v38, %v1281_v37 }
  0x95   : > { %v725_v45 = vpack.c.bf16 %v1285_v40, %v311_v39  ;;  %v729_v46 = vpack.c.bf16 %v1287_v42, %v470_v41 }
  0x96   : > { %724 = vmatprep.subr.bf16.mxu0 %v723_v43  ;;  %728 = vmatprep.subr.bf16.mxu1 %v727_v44 }
  0x97   : > { %726 = vmatpush1.bf16.msra.mxu0 %v725_v45  ;;  %730 = vmatpush1.bf16.msra.mxu1 %v729_v46 }
  0x9a   : > { %701 = vmatmul.mubr.msk.f32.vlgmr.msra.gmra.mrb[0].mxu0 %vm325_vm0, %v264_v47  ;;  %707 = vmatmul.mubr.msk.f32.vlgmr.msra.gmra.mrb[0].mxu1 %vm325_vm0, %v264_v47 }
  0x9b   : > { %402 = vmatprep.mubr.f32.mxu0 %v1015_v1  ;;  %544 = vmatprep.mubr.f32.mxu1 %v1015_v1 }
  0x9e   : > { %702 = vmatmul.mubr.msk.f32.gmra.mrb[2].mxu0 %vm325_vm0, %v265_v48  ;;  %708 = vmatmul.mubr.msk.f32.gmra.mrb[2].mxu1 %vm325_vm0, %v265_v48 }
 0x10a   : > { %v318_v55 = vpop.permute.xlu0 %317 }
 0x10e   : > { %v323_v9 = vpop.permute.xlu0 %322 }
 0x16d   : > { %v398_v59 = vpop.f32.mrb[0].mxu0  ;;  %v540_v60 = vpop.f32.mrb[0].mxu1 }
 0x16e   : > { %v399_v62 = vadd.f32 %v398_v59, %v318_v55  ;;  %v541_v0 = vadd.f32 %v540_v60, %v318_v55  ;;  %v400_v1 = vpop.f32.mrb[1].mxu0  ;;  %v542_v3 = vpop.f32.mrb[1].mxu1 }
 0x16f   : > { %v401_v4 = vadd.f32 %v400_v1, %v318_v55  ;;  %v543_v5 = vadd.f32 %v542_v3, %v318_v55 }
 0x170   : > { %v427_v6 = vmul.f32 %v422_v58, %v399_v62  ;;  %v551_v7 = vmul.f32 %v541_v0, %v422_v58 }
 0x171   : > { %v428_v10 = vmul.f32 %v426_v61, %v401_v4  ;;  %v552_v11 = vmul.f32 %v543_v5, %v426_v61  ;;  %v404_v12 = vpop.f32.mrb[2].mxu0  ;;  %v546_v13 = vpop.f32.mrb[2].mxu1 }
 0x172   : > { %v449_v8 = vadd.f32 %v444_v63, %v427_v6  ;;  %v555_v14 = vadd.f32 %v551_v7, %v444_v63  ;;  %v405_v15 = vadd.f32 %v404_v12, %v323_v9  ;;  %v547_v16 = vadd.f32 %v546_v13, %v323_v9  ;;  %v406_v17 = vpop.f32.mrb[3].mxu0  ;;  %v548_v18 = vpop.f32.mrb[3].mxu1 }
 0x173   : > { %v450_v19 = vadd.f32 %v448_v2, %v428_v10  ;;  %v556_v20 = vadd.f32 %v552_v11, %v448_v2  ;;  %v407_v21 = vadd.f32 %v406_v17, %v323_v9  ;;  %v549_v22 = vadd.f32 %v548_v18, %v323_v9 }
 0x174   : > { %v453_v23 = vadd.f32 %v449_v8, %v311_v39  ;;  %v559_v24 = vadd.f32 %v555_v14, %v470_v41  ;;  %v429_v25 = vmul.f32 %v422_v58, %v405_v15  ;;  %v553_v26 = vmul.f32 %v547_v16, %v422_v58 }
 0x175   : > { %v454_v27 = vadd.f32 %v450_v19, %v1277_v35  ;;  %v560_v28 = vadd.f32 %v556_v20, %v1281_v37  ;;  %v430_v29 = vmul.f32 %v426_v61, %v407_v21  ;;  %v554_v30 = vmul.f32 %v549_v22, %v426_v61 }
 0x176   : > { %457 = vst [vmem:[%s258_s23] sm:$0xff] %v453_v23  ;;  %709 = vst [vmem:[%s258_s23 + $0x20] sm:$0xff] %v559_v24  ;;  %v451_v31 = vadd.f32 %v444_v63, %v429_v25  ;;  %v557_v32 = vadd.f32 %v553_v26, %v444_v63 }
 0x177   : > { %458 = vst [vmem:[%s258_s23 + $0x8] sm:$0xff] %v454_v27  ;;  %710 = vst [vmem:[%s258_s23 + $0x28] sm:$0xff] %v560_v28  ;;  %v452_v33 = vadd.f32 %v448_v2, %v430_v29  ;;  %v558_v34 = vadd.f32 %v554_v30, %v448_v2 }
 0x178   : > { %v455_v35 = vadd.f32 %v451_v31, %v1285_v40  ;;  %v561_v37 = vadd.f32 %v557_v32, %v1287_v42 }
 0x179   : > { %v456_v39 = vadd.f32 %v452_v33, %v1279_v36  ;;  %v562_v41 = vadd.f32 %v558_v34, %v1283_v38 }
 0x17a   : > { %459 = vst [vmem:[%s258_s23 + $0x10] sm:$0xff] %v455_v35  ;;  %711 = vst [vmem:[%s258_s23 + $0x30] sm:$0xff] %v561_v37 }
 0x17b   : > { %460 = vst [vmem:[%s258_s23 + $0x18] sm:$0xff] %v456_v39  ;;  %712 = vst [vmem:[%s258_s23 + $0x38] sm:$0xff] %v562_v41 }
 0x17c   : > { %944 = shalt.err (!%p941_p4)
}
 0x17d   : > { %s945_s27 = scalar_lea.hbm %s1313_s19, 1024  ;;  %s949_s14 = scalar_lea.hbm %s1364_s4, 4096 }
 0x17e   : > { %p946_p9 = scmp.ne.s32.totalorder %s1313_s19, %s945_s27  ;;  %p950_p8 = scmp.lt.u32.totalorder %s1313_s19, %s1364_s4 }
 0x17f   : > { %p951_p12 = scmp.lt.u32.totalorder %s949_s14, %s945_s27  ;;  %p953_p0 = scmp.lt.u32.totalorder %s945_s27, %s1313_s19 }
 0x180   : > { %p947_p13 = pnand %p946_p9, %p1189_p5 }
 0x181   : > { %p952_p6 = por %p951_p12, %p950_p8 }
 0x182   : > { %p948_p10 = pneg %p947_p13 }
 0x183   : > { %p954_p3 = por %p953_p0, %p952_p6 }
 0x185   : > { %p955_p7 = pnand %p954_p3, %p948_p10 }
 0x187   : > { %958 = shalt.err (!%p955_p7)
}
 0x188   : > { %s1018_s21 = smov 256   ;;  %s1019_s23 = smov 16  }
 0x189   : > { %745 = dma.vmem_to_hbm [thread:$0]  (%p1189_p5), %s1315_s29, 1024, %s1313_s19, %s569_s8, %s1018_s21, %s1018_s21, %s1019_s23  }
 0x18a PF: > { %p772_p11 = scmp.ge.s32.totalorder %s1005_s18, 2  ;;  %s598_s6 = sand.u32 1, %s993_s15  }
 0x18b   : > { %p1382_p2 = scmp.ne.s32.totalorder %s1369_s22, 0  ;;  %s599_s7 = scalar_lea.sflag [#allocation4], %s598_s6 }
 0x18d   : > { %p762_p1 = pnand %p772_p11, %p1382_p2 }
 0x18f   : > { %988 = dma.done.wait (!%p762_p1), %s599_s7, 1024  }
 0x190   : > { %990 = vsyncadd (!%p762_p1), %s599_s7, 4294966272  ;;  %p19_p4 = scmp.ge.s32.totalorder %s1175_s10, 6   ;;  %s1383_s15 = smov %s997_s16 }
 0x191   : > { %s1384_s16 = smov %s1001_s17  ;;  %s1385_s17 = smov %s1185_s11 }
 0x192   : > { %s1386_s18 = smov %s1175_s10  ;;  %21 = sbr.rel (!%p19_p4) target bundleno = 7 (0x7), region = 95 }
 0x199   :  { %604 = vsyncpa [#allocation3], 1 }
 0x19a   :  { %606 = vsyncpa [#allocation3 + $0x1], 1 }
 0x19b   :  { %607 = vsyncpa [#allocation6], 1 }
 0x19c   :  { %608 = vsyncpa [#allocation9], 1 }
 0x19d   :  { %609 = vsyncpa [#allocation4], 1 }
 0x19e   :  { %611 = vsyncpa [#allocation4 + $0x1], 1 }

</bundles_post_ra>
